<compile_context>
chip_gen: v7x
topology: tpu7x:2x2x1
jax: 0.10.0
libtpu: 0.0.40
codegen_flags: <defaults>
</compile_context>

<pallas_src>
import jax
import jax.numpy as jnp
from jax import lax
from jax.experimental import pallas as pl
from jax.experimental.pallas import tpu as pltpu

NEG = -1e30  # stands in for the pool's -inf padding (v1*clamp(v1+3,0,6) >= -2.25)


def _round_up(v, m):
    return (v + m - 1) // m * m


def _model_kernel(w1_ref, b1_ref, w2_ref, b2_ref, x_ref, o_ref, canvas_ref):
    # x_ref      : (NB, C, H, W)   raw input block (no pre-padding)
    # o_ref      : (NB, C, P, Q)   final output, P = H+4, Q = W+4
    # canvas_ref : (C, PP, QQ)     tile-aligned scratch canvas, PP >= P, QQ >= Q
    NB, C, H, W = x_ref.shape
    P, Q = o_ref.shape[2], o_ref.shape[3]
    PP, QQ = canvas_ref.shape[1], canvas_ref.shape[2]

    # Ring / dead-region mask of the padded canvas: everything outside the open
    # interior rows 1..P-2, cols 1..Q-2 of the real (P, Q) window.  Computed
    # once per grid step and reused by every channel / image.
    pi = lax.broadcasted_iota(jnp.int32, (PP, QQ), 0)
    qi = lax.broadcasted_iota(jnp.int32, (PP, QQ), 1)
    ring = (pi == 0) | (pi >= P - 1) | (qi == 0) | (qi >= Q - 1)

    # Zero the canvas once; only the x region (rows 0..H-1, cols 0..W-1) is
    # overwritten below, so the zero margin persists across images.
    canvas_ref[...] = jnp.zeros_like(canvas_ref)

    for n in range(NB):
        # Tile-aligned store of the raw image at the canvas origin, then shift
        # to offset (2, 2) with two XLU rolls per channel (the wrap-around only
        # picks up zero margin rows/cols).  This replaces the old wrapper-side
        # jnp.pad HBM round trip.
        src = []
        for c in range(C):
            canvas_ref[c, 0:H, 0:W] = x_ref[n, c]
            plane = canvas_ref[c]
            plane = pltpu.roll(plane, shift=2, axis=0)
            plane = pltpu.roll(plane, shift=2, axis=1)
            src.append(plane)  # zero-padded conv1 input, x at rows/cols [2, 2+H)

        pooled = []
        for o in range(C):
            # conv1: 1x1 conv (padding=1) == per-pixel channel mix on the VPU.
            v1 = w1_ref[o, 0] * src[0]
            for c in range(1, C):
                v1 = v1 + w1_ref[o, c] * src[c]
            v1 = v1 + b1_ref[o]
            # hardswish numerator; the /6 is folded into conv2's weights
            # (max-pool commutes with the positive 1/6 scale).
            v5 = v1 * jnp.clip(v1 + 3.0, 0.0, 6.0)
            # MaxPool2d(3, stride=1, padding=1) via XLU rolls.  The ring plays
            # the -inf pool padding; roll wrap-around only lands in ring / dead
            # rows and cols, which are masked again below.
            v5 = jnp.where(ring, NEG, v5)
            rmax = jnp.maximum(
                v5, jnp.maximum(pltpu.roll(v5, shift=1, axis=0),
                                pltpu.roll(v5, shift=PP - 1, axis=0)))
            pool = jnp.maximum(
                rmax, jnp.maximum(pltpu.roll(rmax, shift=1, axis=1),
                                  pltpu.roll(rmax, shift=QQ - 1, axis=1)))
            # The ring becomes conv2's zero padding.
            pooled.append(jnp.where(ring, 0.0, pool))

        # conv2 (1x1, padding=1) with folded 1/6 + affine; write each output
        # plane straight to o_ref (no jnp.stack / extra VMEM materialisation).
        for o in range(C):
            acc = w2_ref[o, 0] * pooled[0]
            for c in range(1, C):
                acc = acc + w2_ref[o, c] * pooled[c]
            acc = acc + b2_ref[o]
            o_ref[n, o] = acc[0:P, 0:Q]


def model_forward(x, w1, b1, w2, b2, images_per_block=1):
    """x: (N, C, H, W); w1, w2: (C, C) 1x1-conv weights; b1, b2: (C,) biases.

    images_per_block=1 keeps both v7x TensorCores busy for N >= 2; on single-TC
    v5e/v6e set images_per_block=N to merge the batch into one grid step.
    """
    N, C, H, W = x.shape
    P, Q = H + 4, W + 4                          # each padding=1 1x1 conv grows H/W by 2
    PP, QQ = _round_up(P, 8), _round_up(Q, 128)  # tile-aligned compute canvas
    NB = images_per_block
    assert N % NB == 0, "images_per_block must divide the batch"

    # Fold hardswish's 1/6 and the trailing affine (x/128 + 31/128) into conv2.
    scale = 0.0078125   # 1/128
    shift = 0.2421875   # 31/128
    w2f = (w2 * (scale / 6.0)).astype(jnp.float32)
    b2f = (b2 * scale + shift).astype(jnp.float32)

    smem = lambda: pl.BlockSpec(memory_space=pltpu.MemorySpace.SMEM)
    return pl.pallas_call(
        _model_kernel,
        out_shape=jax.ShapeDtypeStruct((N, C, P, Q), jnp.float32),
        grid=(N // NB,),
        in_specs=[smem(), smem(), smem(), smem(),
                  pl.BlockSpec((NB, C, H, W), lambda g: (g, 0, 0, 0))],
        out_specs=pl.BlockSpec((NB, C, P, Q), lambda g: (g, 0, 0, 0)),
        scratch_shapes=[pltpu.VMEM((C, PP, QQ), jnp.float32)],
        compiler_params=pltpu.CompilerParams(
            dimension_semantics=("parallel",)),
    )(w1.astype(jnp.float32), b1.astype(jnp.float32), w2f, b2f,
      x.astype(jnp.float32))


def ref_forward(x, w1, b1, w2, b2):
    # Pure-JAX reference matching the PyTorch semantics.
    xp = jnp.pad(x, ((0, 0), (0, 0), (1, 1), (1, 1)))
    v1 = jnp.einsum('oc,nchw->nohw', w1, xp) + b1[None, :, None, None]
    v6 = v1 * jnp.clip(v1 + 3.0, 0.0, 6.0) / 6.0
    v6p = jnp.pad(v6, ((0, 0), (0, 0), (1, 1), (1, 1)),
                  constant_values=-jnp.inf)
    v7 = lax.reduce_window(v6p, -jnp.inf, lax.max,
                           (1, 1, 3, 3), (1, 1, 1, 1), 'VALID')
    v7p = jnp.pad(v7, ((0, 0), (0, 0), (1, 1), (1, 1)))
    v8 = jnp.einsum('oc,nchw->nohw', w2, v7p) + b2[None, :, None, None]
    return v8 * 0.0078125 + 0.2421875


if __name__ == "__main__":
    key = jax.random.PRNGKey(0)
    kx, k1, k2, k3, k4 = jax.random.split(key, 5)
    N, C, H, W = 2, 3, 16, 16          # small test shapes; C = 3 fixed by the module
    x = jax.random.normal(kx, (N, C, H, W), jnp.float32)

    # Conv2d(3, 3, kernel_size=1) parameters: weight (out, in) since k=1, bias (out,)
    bound = 1.0 / (C ** 0.5)
    w1 = jax.random.uniform(k1, (C, C), jnp.float32, -bound, bound)
    b1 = jax.random.uniform(k2, (C,), jnp.float32, -bound, bound)
    w2 = jax.random.uniform(k3, (C, C), jnp.float32, -bound, bound)
    b2 = jax.random.uniform(k4, (C,), jnp.float32, -bound, bound)

    out = jax.block_until_ready(model_forward(x, w1, b1, w2, b2))
    expected = ref_forward(x, w1, b1, w2, b2)

    assert out.shape == (N, C, H + 4, W + 4), out.shape
    if not jnp.allclose(out, expected, atol=1e-5, rtol=1e-5):
        raise AssertionError("Pallas kernel output mismatch vs reference")
    print("KERNEL_OK")
</pallas_src>

<mosaic_0001>
module attributes {stable_mosaic.version = 11 : i64} {
  func.func @_model_kernel(%arg0: i32, %arg1: memref<3x3xf32, #tpu.memory_space<smem>>, %arg2: memref<3xf32, #tpu.memory_space<smem>>, %arg3: memref<3x3xf32, #tpu.memory_space<smem>>, %arg4: memref<3xf32, #tpu.memory_space<smem>>, %arg5: memref<1x3x16x16xf32, #tpu.memory_space<vmem>>, %arg6: memref<1x3x20x20xf32, #tpu.memory_space<vmem>>, %arg7: memref<3x24x128xf32, #tpu.memory_space<vmem>>) attributes {dimension_semantics = [#tpu.dimension_semantics<parallel>], iteration_bounds = array<i64: 2>, scalar_prefetch = 0 : i64, scratch_operands = 1 : i64, tpu.core_type = #tpu.core_type<tc>, window_params = [{transform_indices = @transform_0, window_bounds = array<i64: 3, 3>}, {transform_indices = @transform_1, window_bounds = array<i64: 3>}, {transform_indices = @transform_2, window_bounds = array<i64: 3, 3>}, {transform_indices = @transform_3, window_bounds = array<i64: 3>}, {transform_indices = @transform_4, window_bounds = array<i64: 1, 3, 16, 16>}, {transform_indices = @transform_5, window_bounds = array<i64: 1, 3, 20, 20>}]} {
    %0 = tpu.iota {dimensions = array<i32: 0>} : vector<24x128xi32>
    %1 = tpu.iota {dimensions = array<i32: 1>} : vector<24x128xi32>
    %c0_i32 = arith.constant 0 : i32
    %2 = vector.broadcast %c0_i32 : i32 to vector<24x128xi32>
    %3 = arith.cmpi eq, %0, %2 : vector<24x128xi32>
    %c19_i32 = arith.constant 19 : i32
    %4 = vector.broadcast %c19_i32 : i32 to vector<24x128xi32>
    %5 = arith.cmpi sge, %0, %4 : vector<24x128xi32>
    %6 = arith.ori %3, %5 : vector<24x128xi1>
    %c0_i32_0 = arith.constant 0 : i32
    %7 = vector.broadcast %c0_i32_0 : i32 to vector<24x128xi32>
    %8 = arith.cmpi eq, %1, %7 : vector<24x128xi32>
    %9 = arith.ori %6, %8 : vector<24x128xi1>
    %c19_i32_1 = arith.constant 19 : i32
    %10 = vector.broadcast %c19_i32_1 : i32 to vector<24x128xi32>
    %11 = arith.cmpi sge, %1, %10 : vector<24x128xi32>
    %12 = arith.ori %9, %11 : vector<24x128xi1>
    %cst = arith.constant 0.000000e+00 : f32
    %13 = vector.broadcast %cst : f32 to vector<3x24x128xf32>
    %c0 = arith.constant 0 : index
    %c0_2 = arith.constant 0 : index
    %c0_3 = arith.constant 0 : index
    %14 = vector.load %arg7[%c0, %c0_2, %c0_3] : memref<3x24x128xf32, #tpu.memory_space<vmem>>, vector<3x24x128xf32>
    tpu.vector_store %arg7[%c0, %c0_2, %c0_3], %13 {strides = array<i32>} : memref<3x24x128xf32, #tpu.memory_space<vmem>>, vector<3x24x128xf32>,
    %c0_4 = arith.constant 0 : index
    %c0_5 = arith.constant 0 : index
    %c0_6 = arith.constant 0 : index
    %c0_7 = arith.constant 0 : index
    %15 = vector.load %arg5[%c0_4, %c0_5, %c0_6, %c0_7] : memref<1x3x16x16xf32, #tpu.memory_space<vmem>>, vector<1x1x16x16xf32>
    %16 = vector.shape_cast %15 : vector<1x1x16x16xf32> to vector<16x16xf32>
    %c0_8 = arith.constant 0 : index
    %c0_9 = arith.constant 0 : index
    %c0_10 = arith.constant 0 : index
    %17 = vector.load %arg7[%c0_8, %c0_9, %c0_10] : memref<3x24x128xf32, #tpu.memory_space<vmem>>, vector<1x16x16xf32>
    %18 = vector.shape_cast %17 : vector<1x16x16xf32> to vector<16x16xf32>
    %19 = vector.shape_cast %16 : vector<16x16xf32> to vector<1x16x16xf32>
    tpu.vector_store %arg7[%c0_8, %c0_9, %c0_10], %19 {strides = array<i32>} : memref<3x24x128xf32, #tpu.memory_space<vmem>>, vector<1x16x16xf32>,
    %c0_11 = arith.constant 0 : index
    %c0_12 = arith.constant 0 : index
    %c0_13 = arith.constant 0 : index
    %20 = vector.load %arg7[%c0_11, %c0_12, %c0_13] : memref<3x24x128xf32, #tpu.memory_space<vmem>>, vector<1x24x128xf32>
    %21 = vector.shape_cast %20 : vector<1x24x128xf32> to vector<24x128xf32>
    %c2_i32 = arith.constant 2 : i32
    %22 = tpu.dynamic_rotate %21 by %c2_i32 dim 0 : vector<24x128xf32>, i32 -> vector<24x128xf32>
    %c2_i32_14 = arith.constant 2 : i32
    %23 = tpu.dynamic_rotate %22 by %c2_i32_14 dim 1 : vector<24x128xf32>, i32 -> vector<24x128xf32>
    %c0_15 = arith.constant 0 : index
    %c1 = arith.constant 1 : index
    %c0_16 = arith.constant 0 : index
    %c0_17 = arith.constant 0 : index
    %24 = vector.load %arg5[%c0_15, %c1, %c0_16, %c0_17] : memref<1x3x16x16xf32, #tpu.memory_space<vmem>>, vector<1x1x16x16xf32>
    %25 = vector.shape_cast %24 : vector<1x1x16x16xf32> to vector<16x16xf32>
    %c1_18 = arith.constant 1 : index
    %c0_19 = arith.constant 0 : index
    %c0_20 = arith.constant 0 : index
    %26 = vector.load %arg7[%c1_18, %c0_19, %c0_20] : memref<3x24x128xf32, #tpu.memory_space<vmem>>, vector<1x16x16xf32>
    %27 = vector.shape_cast %26 : vector<1x16x16xf32> to vector<16x16xf32>
    %28 = vector.shape_cast %25 : vector<16x16xf32> to vector<1x16x16xf32>
    tpu.vector_store %arg7[%c1_18, %c0_19, %c0_20], %28 {strides = array<i32>} : memref<3x24x128xf32, #tpu.memory_space<vmem>>, vector<1x16x16xf32>,
    %c1_21 = arith.constant 1 : index
    %c0_22 = arith.constant 0 : index
    %c0_23 = arith.constant 0 : index
    %29 = vector.load %arg7[%c1_21, %c0_22, %c0_23] : memref<3x24x128xf32, #tpu.memory_space<vmem>>, vector<1x24x128xf32>
    %30 = vector.shape_cast %29 : vector<1x24x128xf32> to vector<24x128xf32>
    %c2_i32_24 = arith.constant 2 : i32
    %31 = tpu.dynamic_rotate %30 by %c2_i32_24 dim 0 : vector<24x128xf32>, i32 -> vector<24x128xf32>
    %c2_i32_25 = arith.constant 2 : i32
    %32 = tpu.dynamic_rotate %31 by %c2_i32_25 dim 1 : vector<24x128xf32>, i32 -> vector<24x128xf32>
    %c0_26 = arith.constant 0 : index
    %c2 = arith.constant 2 : index
    %c0_27 = arith.constant 0 : index
    %c0_28 = arith.constant 0 : index
    %33 = vector.load %arg5[%c0_26, %c2, %c0_27, %c0_28] : memref<1x3x16x16xf32, #tpu.memory_space<vmem>>, vector<1x1x16x16xf32>
    %34 = vector.shape_cast %33 : vector<1x1x16x16xf32> to vector<16x16xf32>
    %c2_29 = arith.constant 2 : index
    %c0_30 = arith.constant 0 : index
    %c0_31 = arith.constant 0 : index
    %35 = vector.load %arg7[%c2_29, %c0_30, %c0_31] : memref<3x24x128xf32, #tpu.memory_space<vmem>>, vector<1x16x16xf32>
    %36 = vector.shape_cast %35 : vector<1x16x16xf32> to vector<16x16xf32>
    %37 = vector.shape_cast %34 : vector<16x16xf32> to vector<1x16x16xf32>
    tpu.vector_store %arg7[%c2_29, %c0_30, %c0_31], %37 {strides = array<i32>} : memref<3x24x128xf32, #tpu.memory_space<vmem>>, vector<1x16x16xf32>,
    %c2_32 = arith.constant 2 : index
    %c0_33 = arith.constant 0 : index
    %c0_34 = arith.constant 0 : index
    %38 = vector.load %arg7[%c2_32, %c0_33, %c0_34] : memref<3x24x128xf32, #tpu.memory_space<vmem>>, vector<1x24x128xf32>
    %39 = vector.shape_cast %38 : vector<1x24x128xf32> to vector<24x128xf32>
    %c2_i32_35 = arith.constant 2 : i32
    %40 = tpu.dynamic_rotate %39 by %c2_i32_35 dim 0 : vector<24x128xf32>, i32 -> vector<24x128xf32>
    %c2_i32_36 = arith.constant 2 : i32
    %41 = tpu.dynamic_rotate %40 by %c2_i32_36 dim 1 : vector<24x128xf32>, i32 -> vector<24x128xf32>
    %c0_37 = arith.constant 0 : index
    %c0_38 = arith.constant 0 : index
    %42 = memref.load %arg1[%c0_37, %c0_38] : memref<3x3xf32, #tpu.memory_space<smem>>
    %43 = vector.broadcast %42 : f32 to vector<24x128xf32>
    %44 = arith.mulf %43, %23 : vector<24x128xf32>
    %c0_39 = arith.constant 0 : index
    %c1_40 = arith.constant 1 : index
    %45 = memref.load %arg1[%c0_39, %c1_40] : memref<3x3xf32, #tpu.memory_space<smem>>
    %46 = vector.broadcast %45 : f32 to vector<24x128xf32>
    %47 = arith.mulf %46, %32 : vector<24x128xf32>
    %48 = arith.addf %44, %47 : vector<24x128xf32>
    %c0_41 = arith.constant 0 : index
    %c2_42 = arith.constant 2 : index
    %49 = memref.load %arg1[%c0_41, %c2_42] : memref<3x3xf32, #tpu.memory_space<smem>>
    %50 = vector.broadcast %49 : f32 to vector<24x128xf32>
    %51 = arith.mulf %50, %41 : vector<24x128xf32>
    %52 = arith.addf %48, %51 : vector<24x128xf32>
    %c0_43 = arith.constant 0 : index
    %53 = memref.load %arg2[%c0_43] : memref<3xf32, #tpu.memory_space<smem>>
    %54 = vector.broadcast %53 : f32 to vector<24x128xf32>
    %55 = arith.addf %52, %54 : vector<24x128xf32>
    %cst_44 = arith.constant 3.000000e+00 : f32
    %56 = vector.broadcast %cst_44 : f32 to vector<24x128xf32>
    %57 = arith.addf %55, %56 : vector<24x128xf32>
    %cst_45 = arith.constant 0.000000e+00 : f32
    %cst_46 = arith.constant 6.000000e+00 : f32
    %58 = vector.broadcast %cst_45 : f32 to vector<24x128xf32>
    %59 = arith.maximumf %58, %57 : vector<24x128xf32>
    %60 = vector.broadcast %cst_46 : f32 to vector<24x128xf32>
    %61 = arith.minimumf %60, %59 : vector<24x128xf32>
    %62 = arith.mulf %55, %61 : vector<24x128xf32>
    %cst_47 = arith.constant -1.000000e+30 : f32
    %63 = vector.broadcast %cst_47 : f32 to vector<24x128xf32>
    %64 = arith.select %12, %63, %62 : vector<24x128xi1>, vector<24x128xf32>
    %c1_i32 = arith.constant 1 : i32
    %65 = tpu.dynamic_rotate %64 by %c1_i32 dim 0 : vector<24x128xf32>, i32 -> vector<24x128xf32>
    %c23_i32 = arith.constant 23 : i32
    %66 = tpu.dynamic_rotate %64 by %c23_i32 dim 0 : vector<24x128xf32>, i32 -> vector<24x128xf32>
    %67 = arith.maximumf %65, %66 : vector<24x128xf32>
    %68 = arith.maximumf %64, %67 : vector<24x128xf32>
    %c1_i32_48 = arith.constant 1 : i32
    %69 = tpu.dynamic_rotate %68 by %c1_i32_48 dim 1 : vector<24x128xf32>, i32 -> vector<24x128xf32>
    %c127_i32 = arith.constant 127 : i32
    %70 = tpu.dynamic_rotate %68 by %c127_i32 dim 1 : vector<24x128xf32>, i32 -> vector<24x128xf32>
    %71 = arith.maximumf %69, %70 : vector<24x128xf32>
    %72 = arith.maximumf %68, %71 : vector<24x128xf32>
    %cst_49 = arith.constant 0.000000e+00 : f32
    %73 = vector.broadcast %cst_49 : f32 to vector<24x128xf32>
    %74 = arith.select %12, %73, %72 : vector<24x128xi1>, vector<24x128xf32>
    %c1_50 = arith.constant 1 : index
    %c0_51 = arith.constant 0 : index
    %75 = memref.load %arg1[%c1_50, %c0_51] : memref<3x3xf32, #tpu.memory_space<smem>>
    %76 = vector.broadcast %75 : f32 to vector<24x128xf32>
    %77 = arith.mulf %76, %23 : vector<24x128xf32>
    %c1_52 = arith.constant 1 : index
    %c1_53 = arith.constant 1 : index
    %78 = memref.load %arg1[%c1_52, %c1_53] : memref<3x3xf32, #tpu.memory_space<smem>>
    %79 = vector.broadcast %78 : f32 to vector<24x128xf32>
    %80 = arith.mulf %79, %32 : vector<24x128xf32>
    %81 = arith.addf %77, %80 : vector<24x128xf32>
    %c1_54 = arith.constant 1 : index
    %c2_55 = arith.constant 2 : index
    %82 = memref.load %arg1[%c1_54, %c2_55] : memref<3x3xf32, #tpu.memory_space<smem>>
    %83 = vector.broadcast %82 : f32 to vector<24x128xf32>
    %84 = arith.mulf %83, %41 : vector<24x128xf32>
    %85 = arith.addf %81, %84 : vector<24x128xf32>
    %c1_56 = arith.constant 1 : index
    %86 = memref.load %arg2[%c1_56] : memref<3xf32, #tpu.memory_space<smem>>
    %87 = vector.broadcast %86 : f32 to vector<24x128xf32>
    %88 = arith.addf %85, %87 : vector<24x128xf32>
    %cst_57 = arith.constant 3.000000e+00 : f32
    %89 = vector.broadcast %cst_57 : f32 to vector<24x128xf32>
    %90 = arith.addf %88, %89 : vector<24x128xf32>
    %cst_58 = arith.constant 0.000000e+00 : f32
    %cst_59 = arith.constant 6.000000e+00 : f32
    %91 = vector.broadcast %cst_58 : f32 to vector<24x128xf32>
    %92 = arith.maximumf %91, %90 : vector<24x128xf32>
    %93 = vector.broadcast %cst_59 : f32 to vector<24x128xf32>
    %94 = arith.minimumf %93, %92 : vector<24x128xf32>
    %95 = arith.mulf %88, %94 : vector<24x128xf32>
    %cst_60 = arith.constant -1.000000e+30 : f32
    %96 = vector.broadcast %cst_60 : f32 to vector<24x128xf32>
    %97 = arith.select %12, %96, %95 : vector<24x128xi1>, vector<24x128xf32>
    %c1_i32_61 = arith.constant 1 : i32
    %98 = tpu.dynamic_rotate %97 by %c1_i32_61 dim 0 : vector<24x128xf32>, i32 -> vector<24x128xf32>
    %c23_i32_62 = arith.constant 23 : i32
    %99 = tpu.dynamic_rotate %97 by %c23_i32_62 dim 0 : vector<24x128xf32>, i32 -> vector<24x128xf32>
    %100 = arith.maximumf %98, %99 : vector<24x128xf32>
    %101 = arith.maximumf %97, %100 : vector<24x128xf32>
    %c1_i32_63 = arith.constant 1 : i32
    %102 = tpu.dynamic_rotate %101 by %c1_i32_63 dim 1 : vector<24x128xf32>, i32 -> vector<24x128xf32>
    %c127_i32_64 = arith.constant 127 : i32
    %103 = tpu.dynamic_rotate %101 by %c127_i32_64 dim 1 : vector<24x128xf32>, i32 -> vector<24x128xf32>
    %104 = arith.maximumf %102, %103 : vector<24x128xf32>
    %105 = arith.maximumf %101, %104 : vector<24x128xf32>
    %cst_65 = arith.constant 0.000000e+00 : f32
    %106 = vector.broadcast %cst_65 : f32 to vector<24x128xf32>
    %107 = arith.select %12, %106, %105 : vector<24x128xi1>, vector<24x128xf32>
    %c2_66 = arith.constant 2 : index
    %c0_67 = arith.constant 0 : index
    %108 = memref.load %arg1[%c2_66, %c0_67] : memref<3x3xf32, #tpu.memory_space<smem>>
    %109 = vector.broadcast %108 : f32 to vector<24x128xf32>
    %110 = arith.mulf %109, %23 : vector<24x128xf32>
    %c2_68 = arith.constant 2 : index
    %c1_69 = arith.constant 1 : index
    %111 = memref.load %arg1[%c2_68, %c1_69] : memref<3x3xf32, #tpu.memory_space<smem>>
    %112 = vector.broadcast %111 : f32 to vector<24x128xf32>
    %113 = arith.mulf %112, %32 : vector<24x128xf32>
    %114 = arith.addf %110, %113 : vector<24x128xf32>
    %c2_70 = arith.constant 2 : index
    %c2_71 = arith.constant 2 : index
    %115 = memref.load %arg1[%c2_70, %c2_71] : memref<3x3xf32, #tpu.memory_space<smem>>
    %116 = vector.broadcast %115 : f32 to vector<24x128xf32>
    %117 = arith.mulf %116, %41 : vector<24x128xf32>
    %118 = arith.addf %114, %117 : vector<24x128xf32>
    %c2_72 = arith.constant 2 : index
    %119 = memref.load %arg2[%c2_72] : memref<3xf32, #tpu.memory_space<smem>>
    %120 = vector.broadcast %119 : f32 to vector<24x128xf32>
    %121 = arith.addf %118, %120 : vector<24x128xf32>
    %cst_73 = arith.constant 3.000000e+00 : f32
    %122 = vector.broadcast %cst_73 : f32 to vector<24x128xf32>
    %123 = arith.addf %121, %122 : vector<24x128xf32>
    %cst_74 = arith.constant 0.000000e+00 : f32
    %cst_75 = arith.constant 6.000000e+00 : f32
    %124 = vector.broadcast %cst_74 : f32 to vector<24x128xf32>
    %125 = arith.maximumf %124, %123 : vector<24x128xf32>
    %126 = vector.broadcast %cst_75 : f32 to vector<24x128xf32>
    %127 = arith.minimumf %126, %125 : vector<24x128xf32>
    %128 = arith.mulf %121, %127 : vector<24x128xf32>
    %cst_76 = arith.constant -1.000000e+30 : f32
    %129 = vector.broadcast %cst_76 : f32 to vector<24x128xf32>
    %130 = arith.select %12, %129, %128 : vector<24x128xi1>, vector<24x128xf32>
    %c1_i32_77 = arith.constant 1 : i32
    %131 = tpu.dynamic_rotate %130 by %c1_i32_77 dim 0 : vector<24x128xf32>, i32 -> vector<24x128xf32>
    %c23_i32_78 = arith.constant 23 : i32
    %132 = tpu.dynamic_rotate %130 by %c23_i32_78 dim 0 : vector<24x128xf32>, i32 -> vector<24x128xf32>
    %133 = arith.maximumf %131, %132 : vector<24x128xf32>
    %134 = arith.maximumf %130, %133 : vector<24x128xf32>
    %c1_i32_79 = arith.constant 1 : i32
    %135 = tpu.dynamic_rotate %134 by %c1_i32_79 dim 1 : vector<24x128xf32>, i32 -> vector<24x128xf32>
    %c127_i32_80 = arith.constant 127 : i32
    %136 = tpu.dynamic_rotate %134 by %c127_i32_80 dim 1 : vector<24x128xf32>, i32 -> vector<24x128xf32>
    %137 = arith.maximumf %135, %136 : vector<24x128xf32>
    %138 = arith.maximumf %134, %137 : vector<24x128xf32>
    %cst_81 = arith.constant 0.000000e+00 : f32
    %139 = vector.broadcast %cst_81 : f32 to vector<24x128xf32>
    %140 = arith.select %12, %139, %138 : vector<24x128xi1>, vector<24x128xf32>
    %c0_82 = arith.constant 0 : index
    %c0_83 = arith.constant 0 : index
    %141 = memref.load %arg3[%c0_82, %c0_83] : memref<3x3xf32, #tpu.memory_space<smem>>
    %142 = vector.broadcast %141 : f32 to vector<24x128xf32>
    %143 = arith.mulf %142, %74 : vector<24x128xf32>
    %c0_84 = arith.constant 0 : index
    %c1_85 = arith.constant 1 : index
    %144 = memref.load %arg3[%c0_84, %c1_85] : memref<3x3xf32, #tpu.memory_space<smem>>
    %145 = vector.broadcast %144 : f32 to vector<24x128xf32>
    %146 = arith.mulf %145, %107 : vector<24x128xf32>
    %147 = arith.addf %143, %146 : vector<24x128xf32>
    %c0_86 = arith.constant 0 : index
    %c2_87 = arith.constant 2 : index
    %148 = memref.load %arg3[%c0_86, %c2_87] : memref<3x3xf32, #tpu.memory_space<smem>>
    %149 = vector.broadcast %148 : f32 to vector<24x128xf32>
    %150 = arith.mulf %149, %140 : vector<24x128xf32>
    %151 = arith.addf %147, %150 : vector<24x128xf32>
    %c0_88 = arith.constant 0 : index
    %152 = memref.load %arg4[%c0_88] : memref<3xf32, #tpu.memory_space<smem>>
    %153 = vector.broadcast %152 : f32 to vector<24x128xf32>
    %154 = arith.addf %151, %153 : vector<24x128xf32>
    %155 = vector.extract_strided_slice %154 {offsets = [0, 0], sizes = [20, 20], strides = [1, 1]} : vector<24x128xf32> to vector<20x20xf32>
    %c0_89 = arith.constant 0 : index
    %c0_90 = arith.constant 0 : index
    %c0_91 = arith.constant 0 : index
    %c0_92 = arith.constant 0 : index
    %156 = vector.load %arg6[%c0_89, %c0_90, %c0_91, %c0_92] : memref<1x3x20x20xf32, #tpu.memory_space<vmem>>, vector<1x1x20x20xf32>
    %157 = vector.shape_cast %156 : vector<1x1x20x20xf32> to vector<20x20xf32>
    %158 = vector.shape_cast %155 : vector<20x20xf32> to vector<1x1x20x20xf32>
    tpu.vector_store %arg6[%c0_89, %c0_90, %c0_91, %c0_92], %158 {strides = array<i32>} : memref<1x3x20x20xf32, #tpu.memory_space<vmem>>, vector<1x1x20x20xf32>,
    %c1_93 = arith.constant 1 : index
    %c0_94 = arith.constant 0 : index
    %159 = memref.load %arg3[%c1_93, %c0_94] : memref<3x3xf32, #tpu.memory_space<smem>>
    %160 = vector.broadcast %159 : f32 to vector<24x128xf32>
    %161 = arith.mulf %160, %74 : vector<24x128xf32>
    %c1_95 = arith.constant 1 : index
    %c1_96 = arith.constant 1 : index
    %162 = memref.load %arg3[%c1_95, %c1_96] : memref<3x3xf32, #tpu.memory_space<smem>>
    %163 = vector.broadcast %162 : f32 to vector<24x128xf32>
    %164 = arith.mulf %163, %107 : vector<24x128xf32>
    %165 = arith.addf %161, %164 : vector<24x128xf32>
    %c1_97 = arith.constant 1 : index
    %c2_98 = arith.constant 2 : index
    %166 = memref.load %arg3[%c1_97, %c2_98] : memref<3x3xf32, #tpu.memory_space<smem>>
    %167 = vector.broadcast %166 : f32 to vector<24x128xf32>
    %168 = arith.mulf %167, %140 : vector<24x128xf32>
    %169 = arith.addf %165, %168 : vector<24x128xf32>
    %c1_99 = arith.constant 1 : index
    %170 = memref.load %arg4[%c1_99] : memref<3xf32, #tpu.memory_space<smem>>
    %171 = vector.broadcast %170 : f32 to vector<24x128xf32>
    %172 = arith.addf %169, %171 : vector<24x128xf32>
    %173 = vector.extract_strided_slice %172 {offsets = [0, 0], sizes = [20, 20], strides = [1, 1]} : vector<24x128xf32> to vector<20x20xf32>
    %c0_100 = arith.constant 0 : index
    %c1_101 = arith.constant 1 : index
    %c0_102 = arith.constant 0 : index
    %c0_103 = arith.constant 0 : index
    %174 = vector.load %arg6[%c0_100, %c1_101, %c0_102, %c0_103] : memref<1x3x20x20xf32, #tpu.memory_space<vmem>>, vector<1x1x20x20xf32>
    %175 = vector.shape_cast %174 : vector<1x1x20x20xf32> to vector<20x20xf32>
    %176 = vector.shape_cast %173 : vector<20x20xf32> to vector<1x1x20x20xf32>
    tpu.vector_store %arg6[%c0_100, %c1_101, %c0_102, %c0_103], %176 {strides = array<i32>} : memref<1x3x20x20xf32, #tpu.memory_space<vmem>>, vector<1x1x20x20xf32>,
    %c2_104 = arith.constant 2 : index
    %c0_105 = arith.constant 0 : index
    %177 = memref.load %arg3[%c2_104, %c0_105] : memref<3x3xf32, #tpu.memory_space<smem>>
    %178 = vector.broadcast %177 : f32 to vector<24x128xf32>
    %179 = arith.mulf %178, %74 : vector<24x128xf32>
    %c2_106 = arith.constant 2 : index
    %c1_107 = arith.constant 1 : index
    %180 = memref.load %arg3[%c2_106, %c1_107] : memref<3x3xf32, #tpu.memory_space<smem>>
    %181 = vector.broadcast %180 : f32 to vector<24x128xf32>
    %182 = arith.mulf %181, %107 : vector<24x128xf32>
    %183 = arith.addf %179, %182 : vector<24x128xf32>
    %c2_108 = arith.constant 2 : index
    %c2_109 = arith.constant 2 : index
    %184 = memref.load %arg3[%c2_108, %c2_109] : memref<3x3xf32, #tpu.memory_space<smem>>
    %185 = vector.broadcast %184 : f32 to vector<24x128xf32>
    %186 = arith.mulf %185, %140 : vector<24x128xf32>
    %187 = arith.addf %183, %186 : vector<24x128xf32>
    %c2_110 = arith.constant 2 : index
    %188 = memref.load %arg4[%c2_110] : memref<3xf32, #tpu.memory_space<smem>>
    %189 = vector.broadcast %188 : f32 to vector<24x128xf32>
    %190 = arith.addf %187, %189 : vector<24x128xf32>
    %191 = vector.extract_strided_slice %190 {offsets = [0, 0], sizes = [20, 20], strides = [1, 1]} : vector<24x128xf32> to vector<20x20xf32>
    %c0_111 = arith.constant 0 : index
    %c2_112 = arith.constant 2 : index
    %c0_113 = arith.constant 0 : index
    %c0_114 = arith.constant 0 : index
    %192 = vector.load %arg6[%c0_111, %c2_112, %c0_113, %c0_114] : memref<1x3x20x20xf32, #tpu.memory_space<vmem>>, vector<1x1x20x20xf32>
    %193 = vector.shape_cast %192 : vector<1x1x20x20xf32> to vector<20x20xf32>
    %194 = vector.shape_cast %191 : vector<20x20xf32> to vector<1x1x20x20xf32>
    tpu.vector_store %arg6[%c0_111, %c2_112, %c0_113, %c0_114], %194 {strides = array<i32>} : memref<1x3x20x20xf32, #tpu.memory_space<vmem>>, vector<1x1x20x20xf32>,
    return
  }
  func.func @transform_0(%arg0: i32) -> (i32, i32) {
    %c0_i32 = arith.constant 0 : i32
    %c0_i32_0 = arith.constant 0 : i32
    %c0_i32_1 = arith.constant 0 : i32
    return %c0_i32, %c0_i32_0 : i32, i32
  }
  func.func @transform_1(%arg0: i32) -> i32 {
    %c0_i32 = arith.constant 0 : i32
    %c0_i32_0 = arith.constant 0 : i32
    return %c0_i32 : i32
  }
  func.func @transform_2(%arg0: i32) -> (i32, i32) {
    %c0_i32 = arith.constant 0 : i32
    %c0_i32_0 = arith.constant 0 : i32
    %c0_i32_1 = arith.constant 0 : i32
    return %c0_i32, %c0_i32_0 : i32, i32
  }
  func.func @transform_3(%arg0: i32) -> i32 {
    %c0_i32 = arith.constant 0 : i32
    %c0_i32_0 = arith.constant 0 : i32
    return %c0_i32 : i32
  }
  func.func @transform_4(%arg0: i32) -> (i32, i32, i32, i32) {
    %c0_i32 = arith.constant 0 : i32
    %c0_i32_0 = arith.constant 0 : i32
    %c0_i32_1 = arith.constant 0 : i32
    %c0_i32_2 = arith.constant 0 : i32
    return %arg0, %c0_i32, %c0_i32_0, %c0_i32_1 : i32, i32, i32, i32
  }
  func.func @transform_5(%arg0: i32) -> (i32, i32, i32, i32) {
    %c0_i32 = arith.constant 0 : i32
    %c0_i32_0 = arith.constant 0 : i32
    %c0_i32_1 = arith.constant 0 : i32
    %c0_i32_2 = arith.constant 0 : i32
    return %arg0, %c0_i32, %c0_i32_0, %c0_i32_1 : i32, i32, i32, i32
  }
}

</mosaic_0001>

<bundles_post_ra>
// kernel: tpu_custom_call.1
= control target key start
LH: loop header
LB: loop body
LE: loop exit
PB: predicated region body
PF: predicated region fallthrough
CT: control target
= control target key end

     0   :  { %10 = vsyncpa [#allocation5], 0  ;;  %s1590_s0 = inlined_call_operand.hbm [shape: f32[3,3], index: 0, kind: input, shape index: {}]   ;;  %s1591_s1 = inlined_call_operand.vmem [shape: f32[3], index: 1, kind: input, shape index: {}]   ;;  %s1592_s2 = inlined_call_operand.vmem [shape: f32[3,3], index: 2, kind: input, shape index: {}]   ;;  %s1593_s3 = inlined_call_operand.vmem [shape: f32[3], index: 3, kind: input, shape index: {}]   ;;  %s1594_s4 = inlined_call_operand.hbm [shape: f32[2,3,16,16], index: 4, kind: input, shape index: {}]   ;;  %s1595_s5 = inlined_call_operand.vmem [shape: f32[2,3,20,20], index: 5, kind: output, shape index: {}]  }
   0x1   :  { %11 = vsyncpa [#allocation6], 0 }
   0x2   :  { %12 = vsyncpa [#allocation9], 0 }
   0x3   :  { %13 = vsyncpa [#allocation4], 0 }
   0x4   :  { %15 = vsyncpa [#allocation4 + $0x1], 0  ;;  %s1146_s18 = smov 0   ;;  %s1148_s19 = smov 0  }
   0x5   :  { %s1150_s20 = smov 0   ;;  %s1152_s21 = smov 0  }
   0x6 LB: > { %s1165_s22 = sadd.s32 4294967295, %s1103_s21   ;;  %p125_p0 = scmp.ne.s32.totalorder %s1095_s19, %s1091_s18  ;;  %s1103_s21 = sphi %s1152_s21, %s1618_s21   ;;  %s1099_s20 = sphi %s1150_s20, %s1617_s20   ;;  %s1095_s19 = sphi %s1148_s19, %s1616_s19   ;;  %s1091_s18 = sphi %s1146_s18, %s1615_s18  }
   0x7   : > { %p1596_p1 = scmp.eq.s32.totalorder %s1165_s22, 0  ;;  %p834_p2 = scmp.ge.s32.totalorder %s1103_s21, 1 }
   0x8   : > { %p162_p3 = scmp.lt.s32.totalorder %s1103_s21, 3  ;;  %s195_s26 = sshll.u32 %s1592_s2, 4  ;;  %s196_s26 = int_to_ptr.vmem [resolvable:$true] %s195_s26 }
   0x9   : > { %p1173_p4 = por %p1596_p1, %p125_p0  ;;  %s184_s30 = sshll.u32 %s1591_s1, 4  ;;  %s1195_s30 = int_to_ptr.vmem [resolvable:$true] %s184_s30 }
   0xa   : > { %p1180_p5 = pnand %p834_p2, %p162_p3  ;;  %s206_s9 = sshll.u32 %s1593_s3, 4  ;;  %s1200_s9 = int_to_ptr.vmem [resolvable:$true] %s206_s9 }
   0xb   : > { %s1598_s23 = scalar_select %p1173_p4, 1, 0 }
   0xc   : > { %p901_p6 = pneg %p1180_p5  ;;  %s969_s10 = scalar_lea.vmem %s196_s26, 64 }
   0xd   : > { %p970_p8 = scmp.ne.s32.totalorder %s196_s26, %s969_s10  ;;  %p977_p12 = scmp.lt.s32.totalorder %s196_s26, %s196_s26 }
   0xe   : > { %p1191_p7 = pnand %p901_p6, %p1596_p1  ;;  %p978_p13 = scmp.lt.s32.totalorder %s969_s10, %s969_s10 }
  0x10   : > { %p971_p9 = pneg %p1191_p7  ;;  %p979_p0 = por %p978_p13, %p977_p12 }
  0x12   : > { %p972_p10 = pnand %p971_p9, %p970_p8 }
  0x14   : > { %p973_p11 = pneg %p972_p10 }
  0x16   : > { %p980_p2 = pnand %p979_p0, %p973_p11 }
  0x18   : > { %983 = shalt.err (!%p980_p2)
}
  0x19   : > { %s1105_s11 = smov [#allocation8]   ;;  %s984_s14 = scalar_lea.hbm %s1590_s0, 64 }
  0x1a   : > { %910 = dma.vmem_to_smem (!%p1191_p7), %s196_s26, 64, %s1105_s11, [#allocation9]  }
  0x1b   : > { %p985_p3 = scmp.ne.s32.totalorder %s1590_s0, %s984_s14  ;;  %p991_p10 = scmp.lt.u32.totalorder %s984_s14, %s1590_s0 }
  0x1d   : > { %p987_p6 = pnand %p985_p3, %p971_p9 }
  0x1f   : > { %p988_p8 = pneg %p987_p6 }
  0x21   : > { %p993_p11 = pnand %p991_p10, %p988_p8 }
  0x23   : > { %996 = shalt.err (!%p993_p11)
}
  0x24   : > { %s1106_s24 = smov [#allocation3]   ;;  %s997_s28 = scalar_lea.vmem %s1195_s30, 16 }
  0x25   : > { %904 = dma.hbm_to_smem (!%p1191_p7), %s1590_s0, 64, %s1106_s24, [#allocation5]  }
  0x26   : > { %p998_p12 = scmp.ne.s32.totalorder %s1195_s30, %s997_s28  ;;  %p1005_p2 = scmp.lt.s32.totalorder %s1195_s30, %s1195_s30 }
  0x27   : > { %p1006_p3 = scmp.lt.s32.totalorder %s997_s28, %s997_s28 }
  0x28   : > { %p1000_p13 = pnand %p998_p12, %p971_p9 }
  0x29   : > { %p1007_p6 = por %p1006_p3, %p1005_p2 }
  0x2a   : > { %p1001_p0 = pneg %p1000_p13 }
  0x2c   : > { %p1008_p8 = pnand %p1007_p6, %p1001_p0 }
  0x2e   : > { %1011 = shalt.err (!%p1008_p8)
}
  0x2f   : > { %s1107_s29 = smov [#allocation7]   ;;  %s1012_s7 = scalar_lea.vmem %s1200_s9, 16 }
  0x30   : > { %907 = dma.vmem_to_smem (!%p1191_p7), %s1195_s30, 16, %s1107_s29, [#allocation6]  }
  0x31   : > { %p1013_p10 = scmp.ne.s32.totalorder %s1200_s9, %s1012_s7  ;;  %p1020_p13 = scmp.lt.s32.totalorder %s1200_s9, %s1200_s9 }
  0x32   : > { %p1021_p2 = scmp.lt.s32.totalorder %s1012_s7, %s1012_s7 }
  0x33   : > { %p1015_p11 = pnand %p1013_p10, %p971_p9 }
  0x34   : > { %p1022_p0 = por %p1021_p2, %p1020_p13 }
  0x35   : > { %p1016_p12 = pneg %p1015_p11 }
  0x37   : > { %p1023_p3 = pnand %p1022_p0, %p1016_p12 }
  0x39   : > { %1026 = shalt.err (!%p1023_p3)
}
  0x3a   : > { %s1108_s8 = smov [#allocation10]   ;;  %s1247_s30 = sadd.s32 1, %s1103_s21  }
  0x3b   : > { %913 = dma.vmem_to_smem (!%p1191_p7), %s1200_s9, 16, %s1108_s8, [#allocation9]  }
  0x3c   : > { %s109_s10 = ssub.s32 %s1103_s21, %s1247_s30  ;;  %s112_s11 = sadd.s32 1, %s1099_s20 }
  0x3d   : > { %p110_p9 = scmp.eq.s32.totalorder %s109_s10, 0  ;;  %p119_p6 = scmp.ne.s32.totalorder %s1099_s20, %s1095_s19 }
  0x3e   : > { %p120_p8 = scmp.eq.s32.totalorder %s1103_s21, 0  ;;  %p922_p11 = scmp.lt.s32.totalorder %s1103_s21, 2 }
  0x3f   : > { %s1256_s6 = scalar_select %p110_p9, %s1099_s20, %s112_s11  }
  0x40   : > { %p121_p10 = por %p120_p8, %p119_p6  ;;  %s217_s12 = sand.u32 1, %s1099_s20  }
  0x41   : > { %s880_s13 = smul.u32 768, %s1103_s21  ;;  %s1272_s21 = scalar_lea.sflag [#allocation4], %s217_s12 }
  0x42   : > { %s879_s14 = smul.u32 48, %s217_s12  ;;  %p1266_p7 = pnand %p922_p11, %p121_p10 }
  0x43   : > { %s1264_s17 = scalar_lea.hbm %s1594_s4, %s880_s13  ;;  %s1032_s29 = scalar_lea.hbm %s1594_s4, 1536 }
  0x44   : > { %s221_s18 = scalar_lea.vmem [#allocation11], %s879_s14  ;;  %s1027_s25 = scalar_lea.hbm %s1264_s17, 768 }
  0x45   : > { %s228_s24 = sshll.u32 %s221_s18, 4  ;;  %p1028_p12 = scmp.ne.s32.totalorder %s1264_s17, %s1027_s25  ;;  %s1270_s24 = int_to_ptr.vmem [resolvable:$true] %s228_s24 }
  0x46   : > { %p1029_p13 = pneg %p1266_p7  ;;  %p1033_p3 = scmp.lt.u32.totalorder %s1264_s17, %s1594_s4 }
  0x47   : > { %p1034_p9 = scmp.lt.u32.totalorder %s1032_s29, %s1027_s25  ;;  %p1036_p8 = scmp.lt.u32.totalorder %s1027_s25, %s1264_s17 }
  0x48   : > { %p1030_p2 = pnand %p1029_p13, %p1028_p12 }
  0x49   : > { %p1035_p6 = por %p1034_p9, %p1033_p3 }
  0x4a   : > { %p1031_p0 = pneg %p1030_p2 }
  0x4b   : > { %p1037_p10 = por %p1036_p8, %p1035_p6 }
  0x4d   : > { %p1038_p11 = pnand %p1037_p10, %p1031_p0 }
  0x4f   : > { %1041 = shalt.err (!%p1038_p11)
}
  0x50   : > { %s1042_s10 = scalar_lea.vmem %s1270_s24, 768  ;;  %s1109_s11 = smov [#allocation11]  }
  0x51   : > { %p1043_p12 = scmp.ne.s32.totalorder %s1270_s24, %s1042_s10  ;;  %s1047_s12 = sshll.u32 %s1109_s11, 4  ;;  %s1048_s12 = int_to_ptr.vmem [resolvable:$false] %s1047_s12 }
  0x52   : > { %s1049_s13 = scalar_lea.vmem %s1048_s12, 1536  ;;  %p1050_p4 = scmp.lt.s32.totalorder %s1270_s24, %s1048_s12 }
  0x53   : > { %p1045_p2 = pnand %p1043_p12, %p1029_p13  ;;  %p1051_p3 = scmp.lt.s32.totalorder %s1049_s13, %s1042_s10 }
  0x55   : > { %p1046_p1 = pneg %p1045_p2  ;;  %p1052_p9 = por %p1051_p3, %p1050_p4 }
  0x57   : > { %p1053_p6 = pnand %p1052_p9, %p1046_p1 }
  0x59   : > { %1056 = shalt.err (!%p1053_p6)
}
  0x5a   : > { %s1110_s14 = smov 128   ;;  %s1111_s15 = smov 8  }
  0x5b   : > { %917 = dma.hbm_to_vmem [thread:$0]  (!%p1266_p7), %s1264_s17, 768, %s1270_s24, %s1272_s21, %s1110_s14, %s1110_s14, %s1111_s15  }
  0x5c   : > { %240 = sbr.rel (%p1180_p5) target bundleno = 445 (0x1bd), region = 40  ;;  %p1602_p13 = scmp.eq.s32.totalorder (!%p1180_p5), %s1165_s22, 0 }
  0x63   : > { %1074 = dma.done.wait (%p1602_p13), [#allocation5], 64   ;;  %p1603_p0 = pmov %p1602_p13 }
  0x65   : > { %1076 = vsyncadd (%p1603_p0), [#allocation5], 4294967232  ;;  %p1604_p1 = pmov %p1603_p0 }
  0x66   : > { %p1605_p4 = pmov %p1603_p0 }
  0x67   : > { %1078 = dma.done.wait (%p1604_p1), [#allocation6], 16  }
  0x68   : > { %1080 = vsyncadd (%p1605_p4), [#allocation6], 4294967280  ;;  %p1606_p8 = pmov %p1603_p0 }
  0x69   : > { %p1607_p7 = pmov %p1603_p0 }
  0x6a   : > { %1082 = dma.done.wait (%p1606_p8), [#allocation9], 80  }
  0x6b   : > { %1084 = vsyncadd (%p1607_p7), [#allocation9], 4294967216  ;;  %s258_s27 = sand.u32 1, %s1095_s19   ;;  %p1608_p5 = scmp.ne.s32.totalorder %s1598_s23, 0 }
  0x6c   : > { %s881_s16 = smul.u32 48, %s258_s27  ;;  %s259_s17 = scalar_lea.sflag [#allocation4], %s258_s27 }
  0x6e   : > { %s262_s9 = scalar_lea.vmem [#allocation11], %s881_s16 }
  0x6f   : > { %1086 = dma.done.wait (%p1608_p5), %s259_s17, 768  }
  0x70   : > { %1088 = vsyncadd (%p1608_p5), %s259_s17, 4294966528 }
  0x71   : > { %267 = sfence }
  0x72   : > { %v327_v0 = vld [vmem:[%s262_s9] sm:$0xff]  ;;  %vm329_vm0 = vcmask 130048   ;;  %v328_v1 = vld [vmem:[%s262_s9 + $0x8] sm:$0xff]  ;;  %v847_v2 = vld [vmem:[%s262_s9 + $0x10] sm:$0xff]  ;;  %v295_v3 = vlaneseq  ;;  %v1112_v4 = vmov 0.0   ;;  %s1113_s23 = smov 2  }
  0x73   : > { %318 = vst [vmem:[#allocation2] sm:$0xff] %v1112_v4  ;;  %319 = vst [vmem:[#allocation2 + $0x8] sm:$0xff] %v1112_v4  ;;  %v848_v5 = vld [vmem:[%s262_s9 + $0x18] sm:$0xff]  ;;  %v849_v6 = vld [vmem:[%s262_s9 + $0x20] sm:$0xff]  ;;  %v337_v9 = vrot.slane %v1112_v4, 6  ;;  %s390_s18 = sld [smem:[#allocation3]] }
  0x74   : > { %321 = vst [vmem:[#allocation2 + $0x18] sm:$0xff] %v1112_v4  ;;  %322 = vst [vmem:[#allocation2 + $0x20] sm:$0xff] %v1112_v4  ;;  %v850_v7 = vld [vmem:[%s262_s9 + $0x28] sm:$0xff]  ;;  %v1325_v8 = vshrl.u32 %v295_v3, 7  ;;  %v1328_v17 = vand.u32 127, %v295_v3  ;;  %s853_s24 = sld [smem:[#allocation3 + $0x80]] }
  0x75   : > { %324 = vst [vmem:[#allocation2 + $0x30] sm:$0xff] %v1112_v4  ;;  %325 = vst [vmem:[#allocation2 + $0x38] sm:$0xff] %v1112_v4  ;;  %s851_s21 = sld [smem:[#allocation3 + $0x1]]  ;;  %s857_s26 = sld [smem:[#allocation3 + $0x100]]  ;;  %vm658_vm13 = vcmask 162816   ;;  %vm661_vm14 = vcmask 158720  }
  0x76   : > { %330 = vst.msk [vmem:[#allocation2] sm:$0xff] %vm329_vm0, %v327_v0  ;;  %331 = vst.msk [vmem:[#allocation2 + $0x8] sm:$0xff] %vm329_vm0, %v328_v1  ;;  %vm338_vm1 = vcmp.lt.s32.totalorder %v1325_v8, 2  ;;  %vm310_vm2 = vcmp.eq.s32.totalorder %v1328_v17, 0  ;;  %vm314_vm3 = vcmp.ge.s32.totalorder %v1328_v17, 19  ;;  %vm301_vm4 = vcmp.eq.s32.totalorder %v1325_v8, 0 }
  0x77   : > { %352 = vst.msk [vmem:[#allocation2 + $0x18] sm:$0xff] %vm329_vm0, %v847_v2  ;;  %353 = vst.msk [vmem:[#allocation2 + $0x20] sm:$0xff] %vm329_vm0, %v848_v5  ;;  %v298_v33 = vadd.s32 16, %v1325_v8  ;;  %s854_s25 = sld [smem:[#allocation3 + $0x81]]  ;;  %s852_s29 = sld [smem:[#allocation3 + $0x2]]  ;;  %vm434_vm11 = vcmp.lt.s32.totalorder %v1325_v8, 1 }
  0x78   : > { %373 = vst.msk [vmem:[#allocation2 + $0x30] sm:$0xff] %vm329_vm0, %v849_v6  ;;  %374 = vst.msk [vmem:[#allocation2 + $0x38] sm:$0xff] %vm329_vm0, %v850_v7  ;;  %s858_s28 = sld [smem:[#allocation3 + $0x101]]  ;;  %s855_s7 = sld [smem:[#allocation3 + $0x82]]  ;;  %vm441_vm12 = vcmp.lt.s32.totalorder %v1325_v8, 7 }
  0x79   : > { %vm311_vm5 = vmor %vm301_vm4, %vm310_vm2  ;;  %vm306_vm7 = vcmp.ge.s32.totalorder %v298_v33, 19  ;;  %s411_s8 = sld [smem:[#allocation7]]  ;;  %s859_s10 = sld [smem:[#allocation3 + $0x102]]  ;;  %v391_v41 = vstv %s390_s18 }
  0x7a   : > { %vm1345_vm6 = vmor %vm311_vm5, %vm314_vm3  ;;  %s856_s11 = sld [smem:[#allocation7 + $0x1]]  ;;  %s860_s12 = sld [smem:[#allocation7 + $0x2]]  ;;  %v473_v42 = vstv %s853_s24 }
  0x7b   : > { %vm313_vm8 = vmor %vm306_vm7, %vm310_vm2  ;;  %v396_v39 = vstv %s851_s21  ;;  %v553_v43 = vstv %s857_s26  ;;  %s1114_s13 = smov 1   ;;  %s1115_s14 = smov 127  }
  0x7c   : > { %vm1364_vm9 = vmor %vm313_vm8, %vm314_vm3  ;;  %s632_s15 = sld [smem:[#allocation8]]  ;;  %s861_s17 = sld [smem:[#allocation8 + $0x1]] }
  0x7d   : > { %v332_v10 = vld [vmem:[#allocation2] sm:$0xff]  ;;  %v333_v11 = vld [vmem:[#allocation2 + $0x8] sm:$0xff]  ;;  %v478_v40 = vstv %s854_s25  ;;  %v404_v45 = vstv %s852_s29  ;;  %vm1377_vm10 = vmor %vm310_vm2, %vm314_vm3  ;;  %s863_s27 = sld [smem:[#allocation8 + $0x80]]  ;;  %s864_s9 = sld [smem:[#allocation8 + $0x81]] }
  0x7e   : > { %v354_v12 = vld [vmem:[#allocation2 + $0x18] sm:$0xff]  ;;  %v335_v13 = vrot.slane %v332_v10, 6  ;;  %v336_v14 = vrot.slane %v333_v11, 6  ;;  %v355_v16 = vld [vmem:[#allocation2 + $0x20] sm:$0xff]  ;;  %v558_v44 = vstv %s858_s28  ;;  %v486_v50 = vstv %s855_s7  ;;  %s870_s16 = sld [smem:[#allocation8 + $0x100]]  ;;  %s862_s18 = sld [smem:[#allocation8 + $0x2]] }
  0x7f   : > { %v357_v15 = vrot.slane %v354_v12, 6  ;;  %v358_v22 = vrot.slane %v355_v16, 6  ;;  %v375_v23 = vld [vmem:[#allocation2 + $0x30] sm:$0xff]  ;;  %v376_v24 = vld [vmem:[#allocation2 + $0x38] sm:$0xff]  ;;  %v566_v51 = vstv %s859_s10  ;;  %v412_v53 = vstv %s411_s8  ;;  %s653_s24 = sld [smem:[#allocation10]]  ;;  %s865_s21 = sld [smem:[#allocation8 + $0x82]] }
  0x80   : > { %v341_v18 = vsel %vm338_vm1, %v337_v9, %v335_v13  ;;  %v339_v19 = vsel %vm338_vm1, %v336_v14, %v337_v9  ;;  %v340_v20 = vsel %vm338_vm1, %v335_v13, %v336_v14  ;;  %v378_v28 = vrot.slane %v375_v23, 6  ;;  %s866_s25 = sld [smem:[#allocation10 + $0x1]]  ;;  %s872_s26 = sld [smem:[#allocation8 + $0x102]] }
  0x81   : > { %342 = vrot.lane.b32.xlu0 %v341_v18, %s1113_s23  ;;  %346 = vrot.lane.b32.xlu1 %v339_v19, %s1113_s23  ;;  %v362_v21 = vsel %vm338_vm1, %v337_v9, %v357_v15  ;;  %v361_v26 = vsel %vm338_vm1, %v357_v15, %v358_v22  ;;  %v360_v27 = vsel %vm338_vm1, %v358_v22, %v337_v9  ;;  %v379_v29 = vrot.slane %v376_v24, 6  ;;  %s873_s28 = sld [smem:[#allocation10 + $0x2]]  ;;  %p290_p10 = scmp.lt.s32.totalorder %s1165_s22, 1 }
  0x82   : > { %v383_v30 = vsel %vm338_vm1, %v337_v9, %v378_v28  ;;  %v494_v54 = vstv %s856_s11  ;;  %v1368_v55 = vstv %s860_s12 }
  0x83   : > { %v382_v31 = vsel %vm338_vm1, %v378_v28, %v379_v29  ;;  %v381_v32 = vsel %vm338_vm1, %v379_v29, %v337_v9  ;;  %s1620_s22 = smov (!%p290_p10, %s1165_s22), 1 }
  0x84   : > { %s882_s29 = smul.u32 72, %s1620_s22 }
  0x85   : > { %344 = vrot.lane.b32.xlu0 %v340_v20, %s1113_s23  ;;  %363 = vrot.lane.b32.xlu1 %v362_v21, %s1113_s23 }
  0x86   : > { %s1538_s8 = scalar_lea.vmem %s1595_s5, %s882_s29 }
  0x89   : > { %365 = vrot.lane.b32.xlu0 %v361_v26, %s1113_s23  ;;  %367 = vrot.lane.b32.xlu1 %v360_v27, %s1113_s23 }
  0x8d   : > { %384 = vrot.lane.b32.xlu0 %v383_v30, %s1113_s23  ;;  %386 = vrot.lane.b32.xlu1 %v382_v31, %s1113_s23 }
  0x91   : > { %388 = vrot.lane.b32.xlu0 %v381_v32, %s1113_s23  ;;  %s871_s23 = sld [smem:[#allocation8 + $0x101]] }
  0xf3   : > { %v343_v35 = vpop.permute.xlu0 %342  ;;  %v347_v36 = vpop.permute.xlu1 %346 }
  0xf4   : > { %v392_v56 = vmul.f32 %v391_v41, %v343_v35  ;;  %v474_v57 = vmul.f32 %v473_v42, %v343_v35  ;;  %v554_v58 = vmul.f32 %v553_v43, %v343_v35  ;;  %v394_v60 = vmul.f32 %v391_v41, %v347_v36 }
  0xf5   : > { %v476_v61 = vmul.f32 %v473_v42, %v347_v36  ;;  %v556_v11 = vmul.f32 %v553_v43, %v347_v36 }
  0xf7   : > { %v345_v37 = vpop.permute.xlu0 %344  ;;  %v364_v38 = vpop.permute.xlu1 %363 }
  0xf8   : > { %v397_v46 = vmul.f32 %v396_v39, %v364_v38  ;;  %v479_v47 = vmul.f32 %v478_v40, %v364_v38  ;;  %v393_v62 = vmul.f32 %v391_v41, %v345_v37  ;;  %v475_v63 = vmul.f32 %v473_v42, %v345_v37 }
  0xf9   : > { %v559_v2 = vmul.f32 %v558_v44, %v364_v38  ;;  %v555_v15 = vmul.f32 %v553_v43, %v345_v37 }
  0xfa   : > { %v400_v0 = vadd.f32 %v397_v46, %v392_v56  ;;  %v482_v1 = vadd.f32 %v479_v47, %v474_v57 }
  0xfb   : > { %v366_v48 = vpop.permute.xlu0 %365  ;;  %v368_v49 = vpop.permute.xlu1 %367  ;;  %v562_v20 = vadd.f32 %v559_v2, %v554_v58 }
  0xfc   : > { %v398_v52 = vmul.f32 %v396_v39, %v366_v48  ;;  %v480_v59 = vmul.f32 %v478_v40, %v366_v48  ;;  %v399_v3 = vmul.f32 %v396_v39, %v368_v49  ;;  %v481_v13 = vmul.f32 %v478_v40, %v368_v49 }
  0xfd   : > { %v560_v21 = vmul.f32 %v558_v44, %v366_v48  ;;  %v561_v35 = vmul.f32 %v558_v44, %v368_v49 }
  0xfe   : > { %v401_v6 = vadd.f32 %v398_v52, %v393_v62  ;;  %v483_v12 = vadd.f32 %v480_v59, %v475_v63  ;;  %v402_v26 = vadd.f32 %v399_v3, %v394_v60  ;;  %v484_v30 = vadd.f32 %v481_v13, %v476_v61 }
  0xff   : > { %v385_v4 = vpop.permute.xlu0 %384  ;;  %v387_v5 = vpop.permute.xlu1 %386  ;;  %v563_v39 = vadd.f32 %v560_v21, %v555_v15  ;;  %v564_v57 = vadd.f32 %v561_v35, %v556_v11 }
 0x100   : > { %v405_v7 = vmul.f32 %v404_v45, %v385_v4  ;;  %v487_v9 = vmul.f32 %v486_v50, %v385_v4  ;;  %v406_v10 = vmul.f32 %v404_v45, %v387_v5  ;;  %v488_v14 = vmul.f32 %v486_v50, %v387_v5 }
 0x101   : > { %v567_v22 = vmul.f32 %v566_v51, %v385_v4  ;;  %v568_v37 = vmul.f32 %v566_v51, %v387_v5 }
 0x102   : > { %v408_v16 = vadd.f32 %v405_v7, %v400_v0  ;;  %v490_v18 = vadd.f32 %v487_v9, %v482_v1  ;;  %v409_v19 = vadd.f32 %v406_v10, %v401_v6  ;;  %v491_v23 = vadd.f32 %v488_v14, %v483_v12 }
 0x103   : > { %v389_v24 = vpop.permute.xlu0 %388  ;;  %v570_v40 = vadd.f32 %v567_v22, %v562_v20  ;;  %v571_v59 = vadd.f32 %v568_v37, %v563_v39 }
 0x104   : > { %v413_v27 = vadd.f32 %v412_v53, %v408_v16  ;;  %v495_v28 = vadd.f32 %v494_v54, %v490_v18  ;;  %v414_v29 = vadd.f32 %v412_v53, %v409_v19  ;;  %v496_v31 = vadd.f32 %v494_v54, %v491_v23 }
 0x105   : > { %v407_v32 = vmul.f32 %v404_v45, %v389_v24  ;;  %v489_v33 = vmul.f32 %v486_v50, %v389_v24  ;;  %v569_v60 = vmul.f32 %v566_v51, %v389_v24  ;;  %v1371_v45 = vadd.f32 %v1368_v55, %v570_v40 }
 0x106   : > { %v416_v36 = vadd.f32 3.0, %v413_v27  ;;  %v417_v38 = vadd.f32 3.0, %v414_v29  ;;  %v498_v46 = vadd.f32 3.0, %v495_v28  ;;  %v499_v48 = vadd.f32 3.0, %v496_v31 }
 0x107   : > { %v410_v41 = vadd.f32 %v407_v32, %v402_v26  ;;  %v492_v42 = vadd.f32 %v489_v33, %v484_v30  ;;  %v572_v0 = vadd.f32 %v569_v60, %v564_v57  ;;  %v578_v17 = vadd.f32 3.0, %v1371_v45 }
 0x108   : > { %v419_v43 = vmax.f32 %v416_v36, 0.0  ;;  %v420_v47 = vmax.f32 %v417_v38, 0.0  ;;  %v501_v62 = vmax.f32 %v498_v46, 0.0  ;;  %v502_v63 = vmax.f32 %v499_v48, 0.0 }
 0x109   : > { %v415_v52 = vadd.f32 %v412_v53, %v410_v41  ;;  %v497_v56 = vadd.f32 %v494_v54, %v492_v42  ;;  %v577_v3 = vadd.f32 %v1368_v55, %v572_v0  ;;  %v576_v9 = vadd.f32 %v1368_v55, %v571_v59 }
 0x10a   : > { %v422_v58 = vmin.f32 %v419_v43, 6.0  ;;  %v423_v50 = vmin.f32 %v420_v47, 6.0  ;;  %v504_v7 = vmin.f32 %v501_v62, 6.0  ;;  %v505_v10 = vmin.f32 %v502_v63, 6.0 }
 0x10b   : > { %v418_v44 = vadd.f32 3.0, %v415_v52  ;;  %v500_v49 = vadd.f32 3.0, %v497_v56  ;;  %v580_v12 = vadd.f32 3.0, %v577_v3  ;;  %v579_v21 = vadd.f32 3.0, %v576_v9 }
 0x10c   : > { %v425_v61 = vmul.f32 %v422_v58, %v413_v27  ;;  %v426_v1 = vmul.f32 %v423_v50, %v414_v29  ;;  %v507_v20 = vmul.f32 %v504_v7, %v495_v28  ;;  %v581_v55 = vmax.f32 %v578_v17, 0.0 }
 0x10d   : > { %v421_v54 = vmax.f32 %v418_v44, 0.0  ;;  %v503_v51 = vmax.f32 %v500_v49, 0.0  ;;  %v583_v24 = vmax.f32 %v580_v12, 0.0  ;;  %v508_v27 = vmul.f32 %v505_v10, %v496_v31 }
 0x10e   : > { %v428_v2 = vsel %vm1345_vm6, -1e+30, %v425_v61  ;;  %v429_v6 = vsel %vm1377_vm10, -1e+30, %v426_v1  ;;  %v510_v38 = vsel %vm1345_vm6, -1e+30, %v507_v20 }
 0x10f   : > { %v424_v4 = vmin.f32 %v421_v54, 6.0  ;;  %v506_v5 = vmin.f32 %v503_v51, 6.0  ;;  %v431_v13 = vrot.slane %v428_v2, 7  ;;  %v432_v14 = vrot.slane %v429_v6, 7 }
 0x110   : > { %v439_v15 = vrot.slane %v429_v6, 1  ;;  %v438_v16 = vrot.slane %v428_v2, 1  ;;  %v582_v37 = vmax.f32 %v579_v21, 0.0  ;;  %v511_v42 = vsel %vm1377_vm10, -1e+30, %v508_v27 }
 0x111   : > { %v427_v11 = vmul.f32 %v424_v4, %v415_v52  ;;  %v509_v19 = vmul.f32 %v506_v5, %v497_v56  ;;  %v436_v26 = vsel %vm434_vm11, %v431_v13, %v432_v14  ;;  %v584_v47 = vmin.f32 %v581_v55, 6.0 }
 0x112   : > { %v443_v32 = vsel %vm441_vm12, %v438_v16, %v439_v15  ;;  %v586_v48 = vmin.f32 %v583_v24, 6.0  ;;  %v513_v52 = vrot.slane %v510_v38, 7  ;;  %v514_v56 = vrot.slane %v511_v42, 7 }
 0x113   : > { %v430_v18 = vsel %vm1364_vm9, -1e+30, %v427_v11  ;;  %v512_v33 = vsel %vm1364_vm9, -1e+30, %v509_v19  ;;  %v520_v57 = vrot.slane %v511_v42, 1  ;;  %v519_v58 = vrot.slane %v510_v38, 1 }
 0x114   : > { %v440_v22 = vrot.slane %v430_v18, 1  ;;  %v433_v23 = vrot.slane %v430_v18, 7  ;;  %v521_v43 = vrot.slane %v512_v33, 1  ;;  %v515_v46 = vrot.slane %v512_v33, 7 }
 0x115   : > { %v585_v60 = vmin.f32 %v582_v37, 6.0  ;;  %v589_v50 = vmul.f32 %v586_v48, %v577_v3  ;;  %v587_v61 = vmul.f32 %v584_v47, %v1371_v45  ;;  %v517_v62 = vsel %vm434_vm11, %v513_v52, %v514_v56 }
 0x116   : > { %v442_v29 = vsel %vm441_vm12, %v439_v15, %v440_v22  ;;  %v437_v30 = vsel %vm434_vm11, %v433_v23, %v431_v13  ;;  %v435_v28 = vsel %vm434_vm11, %v432_v14, %v433_v23  ;;  %v444_v31 = vsel %vm441_vm12, %v440_v22, %v438_v16 }
 0x117   : > { %v446_v35 = vmax.f32 %v436_v26, %v442_v29  ;;  %v445_v36 = vmax.f32 %v437_v30, %v443_v32  ;;  %v447_v41 = vmax.f32 %v435_v28, %v444_v31  ;;  %v522_v44 = vsel %vm441_vm12, %v520_v57, %v521_v43 }
 0x118   : > { %v518_v49 = vsel %vm434_vm11, %v515_v46, %v513_v52  ;;  %v523_v63 = vsel %vm441_vm12, %v519_v58, %v520_v57  ;;  %v526_v0 = vmax.f32 %v517_v62, %v522_v44  ;;  %v588_v51 = vmul.f32 %v585_v60, %v576_v9 }
 0x119   : > { %v1408_v39 = vmax.f32 %v429_v6, %v446_v35  ;;  %v1410_v40 = vmax.f32 %v428_v2, %v445_v36  ;;  %v1418_v59 = vmax.f32 %v430_v18, %v447_v41  ;;  %v525_v54 = vmax.f32 %v518_v49, %v523_v63 }
 0x11a   : > { %v516_v1 = vsel %vm434_vm11, %v514_v56, %v515_v46  ;;  %v524_v2 = vsel %vm441_vm12, %v521_v43, %v519_v58  ;;  %v592_v3 = vsel %vm1364_vm9, -1e+30, %v589_v50  ;;  %v590_v45 = vsel %vm1345_vm6, -1e+30, %v587_v61 }
 0x11b   : > { %453 = vrot.lane.b32.xlu0 %v1408_v39, %s1114_s13  ;;  %451 = vrot.lane.b32.xlu1 %v1410_v40, %s1114_s13  ;;  %v1445_v4 = vmax.f32 %v511_v42, %v526_v0  ;;  %v528_v5 = vmax.f32 %v510_v38, %v525_v54  ;;  %v527_v6 = vmax.f32 %v516_v1, %v524_v2  ;;  %v591_v7 = vsel %vm1377_vm10, -1e+30, %v588_v51 }
 0x11c   : > { %v601_v17 = vrot.slane %v592_v3, 1  ;;  %v595_v9 = vrot.slane %v592_v3, 7  ;;  %v593_v10 = vrot.slane %v590_v45, 7  ;;  %v594_v11 = vrot.slane %v591_v7, 7 }
 0x11d   : > { %v600_v12 = vrot.slane %v591_v7, 1  ;;  %v599_v13 = vrot.slane %v590_v45, 1  ;;  %v1452_v14 = vmax.f32 %v512_v33, %v527_v6  ;;  %v633_v58 = vstv %s632_s15 }
 0x11e   : > { %v598_v16 = vsel %vm434_vm11, %v595_v9, %v593_v10  ;;  %v597_v18 = vsel %vm434_vm11, %v593_v10, %v594_v11  ;;  %v596_v22 = vsel %vm434_vm11, %v594_v11, %v595_v9  ;;  %v664_v60 = vstv %s863_s27 }
 0x11f   : > { %457 = vrot.lane.b32.xlu0 %v1410_v40, %s1115_s14  ;;  %455 = vrot.lane.b32.xlu1 %v1418_v59, %s1114_s13  ;;  %v602_v15 = vsel %vm441_vm12, %v600_v12, %v601_v17  ;;  %v603_v19 = vsel %vm441_vm12, %v599_v13, %v600_v12  ;;  %v604_v23 = vsel %vm441_vm12, %v601_v17, %v599_v13  ;;  %v694_v49 = vstv %s870_s16 }
 0x120   : > { %v606_v20 = vmax.f32 %v597_v18, %v602_v15  ;;  %v605_v21 = vmax.f32 %v598_v16, %v603_v19  ;;  %v607_v26 = vmax.f32 %v596_v22, %v604_v23  ;;  %v638_v61 = vstv %s861_s17 }
 0x121   : > { %v669_v62 = vstv %s864_s9  ;;  %v699_v0 = vstv %s871_s23  ;;  %v1511_v6 = vstv %s872_s26 }
 0x122   : > { %v1473_v55 = vmax.f32 %v591_v7, %v606_v20  ;;  %v1475_v24 = vmax.f32 %v590_v45, %v605_v21  ;;  %v1481_v27 = vmax.f32 %v592_v3, %v607_v26  ;;  %v1500_v3 = vstv %s862_s18 }
 0x123   : > { %461 = vrot.lane.b32.xlu0 %v1418_v59, %s1115_s14  ;;  %459 = vrot.lane.b32.xlu1 %v1408_v39, %s1115_s14  ;;  %v1513_v7 = vstv %s873_s28 }
 0x127   : > { %533 = vrot.lane.b32.xlu0 %v1445_v4, %s1114_s13  ;;  %531 = vrot.lane.b32.xlu1 %v528_v5, %s1114_s13 }
 0x12b   : > { %537 = vrot.lane.b32.xlu0 %v528_v5, %s1115_s14  ;;  %535 = vrot.lane.b32.xlu1 %v1452_v14, %s1114_s13 }
 0x12f   : > { %541 = vrot.lane.b32.xlu0 %v1452_v14, %s1115_s14  ;;  %539 = vrot.lane.b32.xlu1 %v1445_v4, %s1115_s14 }
 0x133   : > { %613 = vrot.lane.b32.xlu0 %v1473_v55, %s1114_s13  ;;  %611 = vrot.lane.b32.xlu1 %v1475_v24, %s1114_s13 }
 0x137   : > { %617 = vrot.lane.b32.xlu0 %v1475_v24, %s1115_s14  ;;  %615 = vrot.lane.b32.xlu1 %v1481_v27, %s1114_s13 }
 0x13b   : > { %621 = vrot.lane.b32.xlu0 %v1481_v27, %s1115_s14  ;;  %619 = vrot.lane.b32.xlu1 %v1473_v55, %s1115_s14 }
 0x18d   : > { %v454_v8 = vpop.permute.xlu0 %453  ;;  %v452_v29 = vpop.permute.xlu1 %451 }
 0x191   : > { %v458_v30 = vpop.permute.xlu0 %457  ;;  %v456_v32 = vpop.permute.xlu1 %455 }
 0x192   : > { %v463_v31 = vmax.f32 %v452_v29, %v458_v30 }
 0x194   : > { %v466_v46 = vmax.f32 %v1410_v40, %v463_v31 }
 0x195   : > { %v462_v28 = vpop.permute.xlu0 %461  ;;  %v460_v33 = vpop.permute.xlu1 %459 }
 0x196   : > { %v465_v42 = vmax.f32 %v456_v32, %v462_v28  ;;  %v464_v43 = vmax.f32 %v454_v8, %v460_v33  ;;  %v469_v63 = vsel %vm1345_vm6, 0.0, %v466_v46 }
 0x197   : > { %v634_v17 = vmul.f32 %v633_v58, %v469_v63  ;;  %v695_v11 = vmul.f32 %v694_v49, %v469_v63 }
 0x198   : > { %v468_v44 = vmax.f32 %v1418_v59, %v465_v42  ;;  %v467_v50 = vmax.f32 %v1408_v39, %v464_v43  ;;  %v1502_v59 = vstv %s653_s24  ;;  %v1504_v39 = vstv %s865_s21 }
 0x199   : > { %v534_v35 = vpop.permute.xlu0 %533  ;;  %v532_v36 = vpop.permute.xlu1 %531 }
 0x19a   : > { %v471_v45 = vsel %vm1364_vm9, 0.0, %v468_v44  ;;  %v470_v9 = vsel %vm1377_vm10, 0.0, %v467_v50 }
 0x19b   : > { %v636_v18 = vmul.f32 %v633_v58, %v471_v45  ;;  %v667_v19 = vmul.f32 %v664_v60, %v471_v45  ;;  %v697_v22 = vmul.f32 %v694_v49, %v471_v45  ;;  %v635_v23 = vmul.f32 %v633_v58, %v470_v9 }
 0x19c   : > { %v666_v26 = vmul.f32 %v664_v60, %v470_v9  ;;  %v696_v8 = vmul.f32 %v694_v49, %v470_v9 }
 0x19d   : > { %v538_v38 = vpop.permute.xlu0 %537  ;;  %v536_v37 = vpop.permute.xlu1 %535 }
 0x19e   : > { %v543_v41 = vmax.f32 %v532_v36, %v538_v38 }
 0x1a0   : > { %v546_v47 = vmax.f32 %v528_v5, %v543_v41  ;;  %v1509_v5 = vstv %s866_s25 }
 0x1a1   : > { %v542_v48 = vpop.permute.xlu0 %541  ;;  %v540_v52 = vpop.permute.xlu1 %539 }
 0x1a2   : > { %v545_v56 = vmax.f32 %v536_v37, %v542_v48  ;;  %v544_v57 = vmax.f32 %v534_v35, %v540_v52  ;;  %v549_v40 = vsel %vm1345_vm6, 0.0, %v546_v47 }
 0x1a3   : > { %v639_v10 = vmul.f32 %v638_v61, %v549_v40  ;;  %v670_v12 = vmul.f32 %v669_v62, %v549_v40  ;;  %v700_v13 = vmul.f32 %v699_v0, %v549_v40 }
 0x1a4   : > { %v548_v54 = vmax.f32 %v1452_v14, %v545_v56  ;;  %v547_v2 = vmax.f32 %v1445_v4, %v544_v57  ;;  %v665_v4 = vmul.f32 %v664_v60, %v469_v63 }
 0x1a5   : > { %v614_v51 = vpop.permute.xlu0 %613  ;;  %v612_v1 = vpop.permute.xlu1 %611  ;;  %v642_v29 = vadd.f32 %v639_v10, %v634_v17  ;;  %v703_v35 = vadd.f32 %v700_v13, %v695_v11 }
 0x1a6   : > { %v551_v14 = vsel %vm1364_vm9, 0.0, %v548_v54  ;;  %v550_v20 = vsel %vm1377_vm10, 0.0, %v547_v2  ;;  %v673_v33 = vadd.f32 %v670_v12, %v665_v4 }
 0x1a7   : > { %v641_v30 = vmul.f32 %v638_v61, %v551_v14  ;;  %v672_v32 = vmul.f32 %v669_v62, %v551_v14  ;;  %v702_v36 = vmul.f32 %v699_v0, %v551_v14  ;;  %v640_v31 = vmul.f32 %v638_v61, %v550_v20 }
 0x1a8   : > { %v671_v41 = vmul.f32 %v669_v62, %v550_v20  ;;  %v701_v47 = vmul.f32 %v699_v0, %v550_v20 }
 0x1a9   : > { %v618_v15 = vpop.permute.xlu0 %617  ;;  %v616_v16 = vpop.permute.xlu1 %615  ;;  %v644_v56 = vadd.f32 %v641_v30, %v636_v18  ;;  %v675_v57 = vadd.f32 %v672_v32, %v667_v19  ;;  %v705_v44 = vadd.f32 %v702_v36, %v697_v22  ;;  %v643_v61 = vadd.f32 %v640_v31, %v635_v23 }
 0x1aa   : > { %v623_v21 = vmax.f32 %v612_v1, %v618_v15  ;;  %v674_v62 = vadd.f32 %v671_v41, %v666_v26  ;;  %v704_v45 = vadd.f32 %v701_v47, %v696_v8 }
 0x1ac   : > { %v626_v28 = vmax.f32 %v1475_v24, %v623_v21 }
 0x1ad   : > { %v622_v38 = vpop.permute.xlu0 %621  ;;  %v620_v37 = vpop.permute.xlu1 %619 }
 0x1ae   : > { %v629_v42 = vsel %vm1345_vm6, 0.0, %v626_v28  ;;  %v625_v43 = vmax.f32 %v616_v16, %v622_v38  ;;  %v624_v46 = vmax.f32 %v614_v51, %v620_v37 }
 0x1af   : > { %v647_v48 = vmul.f32 %v1500_v3, %v629_v42  ;;  %v678_v52 = vmul.f32 %v1504_v39, %v629_v42  ;;  %v708_v24 = vmul.f32 %v1511_v6, %v629_v42 }
 0x1b0   : > { %v628_v58 = vmax.f32 %v1481_v27, %v625_v43  ;;  %v627_v60 = vmax.f32 %v1473_v55, %v624_v46 }
 0x1b1   : > { %v650_v49 = vadd.f32 %v647_v48, %v642_v29  ;;  %v681_v50 = vadd.f32 %v678_v52, %v673_v33  ;;  %v711_v25 = vadd.f32 %v708_v24, %v703_v35 }
 0x1b2   : > { %v631_v63 = vsel %vm1364_vm9, 0.0, %v628_v58  ;;  %v630_v55 = vsel %vm1377_vm10, 0.0, %v627_v60 }
 0x1b3   : > { %v655_v27 = vadd.f32 %v1502_v59, %v650_v49  ;;  %v686_v0 = vadd.f32 %v1509_v5, %v681_v50  ;;  %v716_v40 = vadd.f32 %v1513_v7, %v711_v25  ;;  %v649_v54 = vmul.f32 %v1500_v3, %v631_v63 }
 0x1b4   : > { %v680_v51 = vmul.f32 %v1504_v39, %v631_v63  ;;  %v710_v1 = vmul.f32 %v1511_v6, %v631_v63  ;;  %v648_v34 = vmul.f32 %v1500_v3, %v630_v55  ;;  %v679_v2 = vmul.f32 %v1504_v39, %v630_v55 }
 0x1b5   : > { %659 = vst.msk [vmem:[%s1538_s8] sm:$0xff] %vm658_vm13, %v655_v27  ;;  %867 = vst.msk [vmem:[%s1538_s8 + $0x18] sm:$0xff] %vm658_vm13, %v686_v0  ;;  %v652_v53 = vadd.f32 %v649_v54, %v644_v56  ;;  %v709_v17 = vmul.f32 %v1511_v6, %v630_v55 }
 0x1b6   : > { %874 = vst.msk [vmem:[%s1538_s8 + $0x30] sm:$0xff] %vm658_vm13, %v716_v40  ;;  %v683_v4 = vadd.f32 %v680_v51, %v675_v57  ;;  %v713_v3 = vadd.f32 %v710_v1, %v705_v44  ;;  %v651_v39 = vadd.f32 %v648_v34, %v643_v61  ;;  %v682_v9 = vadd.f32 %v679_v2, %v674_v62 }
 0x1b7   : > { %v657_v10 = vadd.f32 %v1502_v59, %v652_v53  ;;  %v712_v11 = vadd.f32 %v709_v17, %v704_v45 }
 0x1b8   : > { %v688_v12 = vadd.f32 %v1509_v5, %v683_v4  ;;  %v718_v13 = vadd.f32 %v1513_v7, %v713_v3  ;;  %v656_v14 = vadd.f32 %v1502_v59, %v651_v39  ;;  %v687_v15 = vadd.f32 %v1509_v5, %v682_v9 }
 0x1b9   : > { %662 = vst.msk [vmem:[%s1538_s8 + $0x10] sm:$0xf] %vm661_vm14, %v657_v10  ;;  %v717_v6 = vadd.f32 %v1513_v7, %v712_v11 }
 0x1ba   : > { %869 = vst.msk [vmem:[%s1538_s8 + $0x28] sm:$0xf] %vm661_vm14, %v688_v12  ;;  %876 = vst.msk [vmem:[%s1538_s8 + $0x40] sm:$0xf] %vm661_vm14, %v718_v13 }
 0x1bb   : > { %660 = vst.msk [vmem:[%s1538_s8 + $0x8] sm:$0xff] %vm658_vm13, %v656_v14  ;;  %868 = vst.msk [vmem:[%s1538_s8 + $0x20] sm:$0xff] %vm658_vm13, %v687_v15 }
 0x1bc   : > { %875 = vst.msk [vmem:[%s1538_s8 + $0x38] sm:$0xff] %vm658_vm13, %v717_v6 }
 0x1bd PF: > { %p18_p11 = scmp.ge.s32.totalorder %s1247_s30, 4   ;;  %s1615_s18 = smov %s1095_s19 }
 0x1be   : > { %s1616_s19 = smov %s1099_s20  ;;  %s1617_s20 = smov %s1256_s6 }
 0x1bf   : > { %s1618_s21 = smov %s1247_s30  ;;  %20 = sbr.rel (!%p18_p11) target bundleno = 6 (0x6), region = 104 }
 0x1c6   :  { %744 = vsyncpa [#allocation4], 1 }
 0x1c7   :  { %746 = vsyncpa [#allocation4 + $0x1], 1 }
 0x1c8   :  { %747 = vsyncpa [#allocation5], 1 }
 0x1c9   :  { %749 = vsyncpa [#allocation5 + $0x1], 1 }
 0x1ca   :  { %750 = vsyncpa [#allocation6], 1 }
 0x1cb   :  { %752 = vsyncpa [#allocation6 + $0x1], 1 }
 0x1cc   :  { %753 = vsyncpa [#allocation9], 1 }

</bundles_post_ra>
